<compile_context>
chip_gen: v7x
topology: tpu7x:2x2x1
jax: 0.10.0
libtpu: 0.0.40
codegen_flags: <defaults>
</compile_context>

<pallas_src>
import functools

import jax
import jax.numpy as jnp
from jax.experimental import pallas as pl
from jax.experimental.pallas import tpu as pltpu


# ----------------------------------------------------------------------------
# helpers
# ----------------------------------------------------------------------------
def _pick_tile(dim, target, unit):
    """Largest multiple of `unit` <= target that divides dim; else the full dim.

    Guarantees block dims are either multiples of the (8,128) tiling unit or
    equal to the full array extent, so tiny toy shapes and real BERT shapes
    both satisfy the TPU BlockSpec constraints.
    """
    if dim <= target:
        return dim
    t = (target // unit) * unit
    while t >= unit:
        if dim % t == 0:
            return t
        t -= unit
    return dim


def _cparams(semantics):
    return pltpu.CompilerParams(
        dimension_semantics=semantics,
        # 48 MiB: headroom under v7x's 64 MiB physical VMEM, well under v5e/v6e.
        vmem_limit_bytes=48 * 1024 * 1024,
    )


# ----------------------------------------------------------------------------
# Tiled matmul + bias  --  used for the fused QKV projection
# ----------------------------------------------------------------------------
def _matmul_bias_kernel(x_ref, w_ref, b_ref, o_ref, acc_ref, *, activation):
    k = pl.program_id(2)

    @pl.when(k == 0)
    def _():
        acc_ref[...] = jnp.zeros_like(acc_ref)

    # Native-dtype MXU operands, f32 accumulation.
    acc_ref[...] += jnp.dot(x_ref[...], w_ref[...],
                            preferred_element_type=jnp.float32)

    @pl.when(k == pl.num_programs(2) - 1)
    def _():
        y = acc_ref[...] + b_ref[...].astype(jnp.float32)
        if activation == "gelu":
            # TODO(synk): HF BERT's default gelu is the exact erf form; tanh
            # approximation used here (small numeric drift vs pretrained model).
            y = jax.nn.gelu(y, approximate=True)
        o_ref[...] = y.astype(o_ref.dtype)


def matmul_bias(x, w, b, activation=None, tm=256, tn=512, tk=512):
    """y = x @ w + b (optionally gelu).  x:(M,K) w:(K,N) b:(N,) -> (M,N)."""
    M, K = x.shape
    N = w.shape[1]
    tm = _pick_tile(M, tm, 8)
    tn = _pick_tile(N, tn, 128)
    tk = _pick_tile(K, tk, 128)
    grid = (M // tm, N // tn, K // tk)
    return pl.pallas_call(
        functools.partial(_matmul_bias_kernel, activation=activation),
        grid=grid,
        in_specs=[
            pl.BlockSpec((tm, tk), lambda i, j, k: (i, k)),
            pl.BlockSpec((tk, tn), lambda i, j, k: (k, j)),
            pl.BlockSpec((1, tn), lambda i, j, k: (0, j)),
        ],
        out_specs=pl.BlockSpec((tm, tn), lambda i, j, k: (i, j)),
        out_shape=jax.ShapeDtypeStruct((M, N), x.dtype),
        scratch_shapes=[pltpu.VMEM((tm, tn), jnp.float32)],
        compiler_params=_cparams(("parallel", "parallel", "arbitrary")),
        cost_estimate=pl.CostEstimate(
            flops=2 * M * K * N,
            transcendentals=0,
            bytes_accessed=4 * (M * K + K * N + M * N)),
    )(x, w, b.reshape(1, N))


# ----------------------------------------------------------------------------
# LayerNorm (no residual) -- embedding LN
# ----------------------------------------------------------------------------
def _layernorm_kernel(x_ref, g_ref, b_ref, o_ref, *, eps):
    x = x_ref[...].astype(jnp.float32)
    mu = jnp.mean(x, axis=-1, keepdims=True)
    var = jnp.mean(jnp.square(x - mu), axis=-1, keepdims=True)
    y = (x - mu) * jax.lax.rsqrt(var + eps)
    o_ref[...] = (y * g_ref[...].astype(jnp.float32)
                  + b_ref[...].astype(jnp.float32)).astype(o_ref.dtype)


def layernorm(x, gamma, beta, eps=1e-12, tm=512):
    M, H = x.shape
    tm = _pick_tile(M, tm, 8)
    return pl.pallas_call(
        functools.partial(_layernorm_kernel, eps=eps),
        grid=(M // tm,),
        in_specs=[
            pl.BlockSpec((tm, H), lambda i: (i, 0)),
            pl.BlockSpec((1, H), lambda i: (0, 0)),
            pl.BlockSpec((1, H), lambda i: (0, 0)),
        ],
        out_specs=pl.BlockSpec((tm, H), lambda i: (i, 0)),
        out_shape=jax.ShapeDtypeStruct((M, H), x.dtype),
        compiler_params=_cparams(("parallel",)),
    )(x, gamma, beta)


# ----------------------------------------------------------------------------
# Fused:  (attn_out @ wo + bo) + residual  ->  LayerNorm
# ----------------------------------------------------------------------------
def _proj_add_ln_kernel(x_ref, w_ref, b_ref, res_ref, g_ref, bln_ref,
                        o_ref, acc_ref, *, eps):
    k = pl.program_id(1)

    @pl.when(k == 0)
    def _():
        acc_ref[...] = jnp.zeros_like(acc_ref)

    acc_ref[...] += jnp.dot(x_ref[...], w_ref[...],
                            preferred_element_type=jnp.float32)

    @pl.when(k == pl.num_programs(1) - 1)
    def _():
        y = (acc_ref[...] + b_ref[...].astype(jnp.float32)
             + res_ref[...].astype(jnp.float32))
        mu = jnp.mean(y, axis=-1, keepdims=True)
        var = jnp.mean(jnp.square(y - mu), axis=-1, keepdims=True)
        y = (y - mu) * jax.lax.rsqrt(var + eps)
        o_ref[...] = (y * g_ref[...].astype(jnp.float32)
                      + bln_ref[...].astype(jnp.float32)).astype(o_ref.dtype)


def proj_add_layernorm(x, w, b, res, gamma, beta, eps=1e-12, tm=256, tk=512):
    """LayerNorm(x @ w + b + res) over the last axis (full H per row block)."""
    M, K = x.shape
    H = w.shape[1]
    tm = _pick_tile(M, tm, 8)
    tk = _pick_tile(K, tk, 128)
    grid = (M // tm, K // tk)
    return pl.pallas_call(
        functools.partial(_proj_add_ln_kernel, eps=eps),
        grid=grid,
        in_specs=[
            pl.BlockSpec((tm, tk), lambda i, k: (i, k)),
            pl.BlockSpec((tk, H), lambda i, k: (k, 0)),
            pl.BlockSpec((1, H), lambda i, k: (0, 0)),
            pl.BlockSpec((tm, H), lambda i, k: (i, 0)),
            pl.BlockSpec((1, H), lambda i, k: (0, 0)),
            pl.BlockSpec((1, H), lambda i, k: (0, 0)),
        ],
        out_specs=pl.BlockSpec((tm, H), lambda i, k: (i, 0)),
        out_shape=jax.ShapeDtypeStruct((M, H), x.dtype),
        scratch_shapes=[pltpu.VMEM((tm, H), jnp.float32)],
        compiler_params=_cparams(("parallel", "arbitrary")),
        cost_estimate=pl.CostEstimate(
            flops=2 * M * K * H,
            transcendentals=0,
            bytes_accessed=4 * (M * K + K * H + 3 * M * H)),
    )(x, w, b.reshape(1, H), res, gamma, beta)


# ----------------------------------------------------------------------------
# Fused FFN:  gelu(x @ w1 + b1) @ w2 + b2 + x  ->  LayerNorm
# The FFN dimension F is tiled (grid axis 1); the (tm, tf) GELU intermediate
# never leaves VMEM and the second matmul accumulates over F blocks into an
# f32 (tm, H) scratch.  Keeps VMEM bounded at real BERT sizes (F=3072).
# ----------------------------------------------------------------------------
def _ffn_ln_kernel(x_ref, w1_ref, b1_ref, w2_ref, b2_ref, g_ref, bln_ref,
                   o_ref, acc_ref, *, eps):
    f = pl.program_id(1)

    @pl.when(f == 0)
    def _():
        acc_ref[...] = jnp.zeros_like(acc_ref)

    x = x_ref[...]
    h = jnp.dot(x, w1_ref[...], preferred_element_type=jnp.float32)
    h = h + b1_ref[...].astype(jnp.float32)
    h = jax.nn.gelu(h, approximate=True)
    acc_ref[...] += jnp.dot(h.astype(x.dtype), w2_ref[...],
                            preferred_element_type=jnp.float32)

    @pl.when(f == pl.num_programs(1) - 1)
    def _():
        y = (acc_ref[...] + b2_ref[...].astype(jnp.float32)
             + x.astype(jnp.float32))
        mu = jnp.mean(y, axis=-1, keepdims=True)
        var = jnp.mean(jnp.square(y - mu), axis=-1, keepdims=True)
        y = (y - mu) * jax.lax.rsqrt(var + eps)
        o_ref[...] = (y * g_ref[...].astype(jnp.float32)
                      + bln_ref[...].astype(jnp.float32)).astype(o_ref.dtype)


def ffn_layernorm(x, w1, b1, w2, b2, gamma, beta, eps=1e-12, tm=256, tf=512):
    M, H = x.shape
    F = w1.shape[1]
    tm = _pick_tile(M, tm, 8)
    tf = _pick_tile(F, tf, 128)
    grid = (M // tm, F // tf)
    return pl.pallas_call(
        functools.partial(_ffn_ln_kernel, eps=eps),
        grid=grid,
        in_specs=[
            pl.BlockSpec((tm, H), lambda i, f: (i, 0)),
            pl.BlockSpec((H, tf), lambda i, f: (0, f)),
            pl.BlockSpec((1, tf), lambda i, f: (0, f)),
            pl.BlockSpec((tf, H), lambda i, f: (f, 0)),
            pl.BlockSpec((1, H), lambda i, f: (0, 0)),
            pl.BlockSpec((1, H), lambda i, f: (0, 0)),
            pl.BlockSpec((1, H), lambda i, f: (0, 0)),
        ],
        out_specs=pl.BlockSpec((tm, H), lambda i, f: (i, 0)),
        out_shape=jax.ShapeDtypeStruct((M, H), x.dtype),
        scratch_shapes=[pltpu.VMEM((tm, H), jnp.float32)],
        compiler_params=_cparams(("parallel", "arbitrary")),
        cost_estimate=pl.CostEstimate(
            flops=4 * M * H * F,
            transcendentals=M * F,
            bytes_accessed=4 * (2 * M * H + 2 * H * F + M * F)),
    )(x, w1, b1.reshape(1, F), w2, b2.reshape(1, H), gamma, beta)


# ----------------------------------------------------------------------------
# Attention: reads the fused (B, S, 3H) QKV slab directly, handles all heads
# in one grid step per batch row, writes a lane-dense (1, S, H) output block.
# ----------------------------------------------------------------------------
def _attention_kernel(qkv_ref, m_ref, o_ref, *, n_heads, scale):
    S, H = o_ref.shape[1], o_ref.shape[2]
    dH = H // n_heads
    qkv = qkv_ref[0]                          # (S, 3H), loaded once
    bias = m_ref[0].astype(jnp.float32)       # (1, S) additive mask

    # Static head loop (unrolled); per-head matmuls share the one grid step so
    # launch/step overhead is amortized across all heads.
    # TODO(synk): at production sizes (dH=64), heads could be grouped further
    # to fill the 256-wide MXU of v6e/v7x.
    head_outs = []
    for h in range(n_heads):
        q = qkv[:, h * dH:(h + 1) * dH]
        k = qkv[:, H + h * dH:H + (h + 1) * dH]
        v = qkv[:, 2 * H + h * dH:2 * H + (h + 1) * dH]
        s = jnp.dot(q, k.T, preferred_element_type=jnp.float32) * scale + bias
        s = s - jnp.max(s, axis=-1, keepdims=True)
        p = jnp.exp(s)
        # Softmax normalization on the EUP (free slot), not the VALU divider.
        p = p * pl.reciprocal(jnp.sum(p, axis=-1, keepdims=True), approx=True)
        head_outs.append(
            jnp.dot(p.astype(v.dtype), v, preferred_element_type=jnp.float32))
    out = jnp.concatenate(head_outs, axis=-1)          # (S, H) lane-dense
    o_ref[...] = out[None].astype(o_ref.dtype)


def mha_attention(qkv, mask_bias, n_heads):
    """qkv:(B,S,3H) fused projections, mask_bias:(B,1,S) additive -> (B,S,H)."""
    B, S, H3 = qkv.shape
    H = H3 // 3
    dH = H // n_heads
    scale = 1.0 / float(dH) ** 0.5
    return pl.pallas_call(
        functools.partial(_attention_kernel, n_heads=n_heads, scale=scale),
        grid=(B,),
        in_specs=[
            pl.BlockSpec((1, S, H3), lambda b: (b, 0, 0)),
            pl.BlockSpec((1, 1, S), lambda b: (b, 0, 0)),
        ],
        out_specs=pl.BlockSpec((1, S, H), lambda b: (b, 0, 0)),
        out_shape=jax.ShapeDtypeStruct((B, S, H), qkv.dtype),
        compiler_params=_cparams(("parallel",)),
        cost_estimate=pl.CostEstimate(
            flops=4 * B * n_heads * S * S * dH,
            transcendentals=B * n_heads * S * S,
            bytes_accessed=4 * (B * S * H3 + B * S + B * S * H)),
    )(qkv, mask_bias)


# ----------------------------------------------------------------------------
# Model: synthetic BERT-style encoder + CLS pooling + Linear(hidden, 2)
# ----------------------------------------------------------------------------
def init_params(key, vocab, hidden, n_layers, ffn, max_pos, n_classes=2):
    keys = iter(jax.random.split(key, 8 + 8 * n_layers))

    def w(shape, scale=0.02):
        return jax.random.normal(next(keys), shape, jnp.float32) * scale

    params = {
        "tok_emb": w((vocab, hidden)),
        "pos_emb": w((max_pos, hidden)),
        "emb_ln_g": jnp.ones((1, hidden), jnp.float32),
        "emb_ln_b": jnp.zeros((1, hidden), jnp.float32),
        "layers": [],
        "cls_w": w((hidden, n_classes)),            # nn.Linear(emb_size, 2)
        "cls_b": jnp.zeros((n_classes,), jnp.float32),
    }
    for _ in range(n_layers):
        params["layers"].append({
            # fused QKV weight/bias: [wq | wk | wv]
            "w_qkv": w((hidden, 3 * hidden)),
            "b_qkv": jnp.zeros((3 * hidden,), jnp.float32),
            "wo": w((hidden, hidden)), "bo": jnp.zeros((hidden,), jnp.float32),
            "ln1_g": jnp.ones((1, hidden), jnp.float32),
            "ln1_b": jnp.zeros((1, hidden), jnp.float32),
            "w1": w((hidden, ffn)), "b1": jnp.zeros((ffn,), jnp.float32),
            "w2": w((ffn, hidden)), "b2": jnp.zeros((hidden,), jnp.float32),
            "ln2_g": jnp.ones((1, hidden), jnp.float32),
            "ln2_b": jnp.zeros((1, hidden), jnp.float32),
        })
    return params


def kgbert_forward(params, input_ids, attention_mask, n_heads):
    """tokens = {'input_ids': (num_node, max_length), 'attention_mask': same}
       returns logits (num_node, 2)."""
    B, S = input_ids.shape
    H = params["tok_emb"].shape[1]

    # Embedding lookup (XLA gather glue) + embedding LayerNorm (Pallas, no
    # zero-residual array is materialized).
    h = params["tok_emb"][input_ids] + params["pos_emb"][None, :S, :]
    h2 = layernorm(h.reshape(B * S, H), params["emb_ln_g"], params["emb_ln_b"])

    # Additive attention mask (1 = attend, 0 = pad), BERT-style.
    mask_bias = ((1.0 - attention_mask.astype(jnp.float32)) * -1e9).reshape(B, 1, S)

    for lp in params["layers"]:
        # Fused QKV projection: one tiled GEMM, one pass over h2.
        qkv = matmul_bias(h2, lp["w_qkv"], lp["b_qkv"])            # (B*S, 3H)
        # Attention reads the QKV slab directly (contiguous reshape, no transpose).
        attn = mha_attention(qkv.reshape(B, S, 3 * H), mask_bias, n_heads)
        # Output projection + residual + LayerNorm in one kernel.
        h2 = proj_add_layernorm(attn.reshape(B * S, H), lp["wo"], lp["bo"],
                                h2, lp["ln1_g"], lp["ln1_b"])
        # FFN (w1 + gelu + w2) + residual + LayerNorm in one kernel (F tiled).
        h2 = ffn_layernorm(h2, lp["w1"], lp["b1"], lp["w2"], lp["b2"],
                           lp["ln2_g"], lp["ln2_b"])

    hidden = h2.reshape(B, S, H)
    # model_type != 'bart'  ->  sentence_representation = outputs[0][:, 0, :]
    cls = hidden[:, 0, :]
    # TODO(synk): BART eos-token gather branch not implemented (model_type is 'bert' here).
    # Final Linear(H, 2) in plain jnp: a 2-lane Pallas output block would force
    # masked partial stores and launch overhead exceeding the compute.
    logits = cls @ params["cls_w"] + params["cls_b"]               # (num_node, 2)
    return logits


if __name__ == "__main__":
    NUM_NODE, SEQ, HIDDEN, HEADS, LAYERS, FFN, VOCAB = 2, 8, 32, 4, 2, 64, 128

    key = jax.random.PRNGKey(0)
    k_param, k_ids = jax.random.split(key)
    params = init_params(k_param, VOCAB, HIDDEN, LAYERS, FFN, SEQ)

    input_ids = jax.random.randint(k_ids, (NUM_NODE, SEQ), 0, VOCAB, dtype=jnp.int32)
    attention_mask = jnp.ones((NUM_NODE, SEQ), jnp.float32).at[1, 6:].set(0.0)

    logits = kgbert_forward(params, input_ids, attention_mask, HEADS)
    jax.block_until_ready(logits)
    assert logits.shape == (NUM_NODE, 2) and logits.dtype == jnp.float32
    print("KERNEL_OK")
</pallas_src>

<mosaic_0001>
module attributes {stable_mosaic.version = 11 : i64} {
  func.func @_layernorm_kernel(%arg0: i32, %arg1: memref<16x32xf32, #tpu.memory_space<vmem>>, %arg2: memref<1x32xf32, #tpu.memory_space<vmem>>, %arg3: memref<1x32xf32, #tpu.memory_space<vmem>>, %arg4: memref<16x32xf32, #tpu.memory_space<vmem>>) attributes {dimension_semantics = [#tpu.dimension_semantics<parallel>], iteration_bounds = array<i64: 1>, scalar_prefetch = 0 : i64, scratch_operands = 0 : i64, tpu.core_type = #tpu.core_type<tc>, window_params = [{transform_indices = @transform_0, window_bounds = array<i64: 16, 32>}, {pipeline_mode = #tpu.pipeline_mode<synchronous>, transform_indices = @transform_1, window_bounds = array<i64: 1, 32>}, {pipeline_mode = #tpu.pipeline_mode<synchronous>, transform_indices = @transform_2, window_bounds = array<i64: 1, 32>}, {transform_indices = @transform_3, window_bounds = array<i64: 16, 32>}]} {
    %c0 = arith.constant 0 : index
    %c0_0 = arith.constant 0 : index
    %0 = vector.load %arg1[%c0, %c0_0] : memref<16x32xf32, #tpu.memory_space<vmem>>, vector<16x32xf32>
    %cst = arith.constant dense<0.000000e+00> : vector<16xf32>
    %1 = vector.multi_reduction <add>, %0, %cst [1] : vector<16x32xf32> to vector<16xf32>
    %2 = vector.shape_cast %1 : vector<16xf32> to vector<16x1xf32>
    %cst_1 = arith.constant 3.200000e+01 : f32
    %3 = vector.broadcast %cst_1 : f32 to vector<16x1xf32>
    %4 = arith.divf %2, %3 : vector<16x1xf32>
    %5 = vector.broadcast %4 : vector<16x1xf32> to vector<16x32xf32>
    %6 = arith.subf %0, %5 : vector<16x32xf32>
    %7 = arith.mulf %6, %6 : vector<16x32xf32>
    %cst_2 = arith.constant dense<0.000000e+00> : vector<16xf32>
    %8 = vector.multi_reduction <add>, %7, %cst_2 [1] : vector<16x32xf32> to vector<16xf32>
    %9 = vector.shape_cast %8 : vector<16xf32> to vector<16x1xf32>
    %cst_3 = arith.constant 3.200000e+01 : f32
    %10 = vector.broadcast %cst_3 : f32 to vector<16x1xf32>
    %11 = arith.divf %9, %10 : vector<16x1xf32>
    %12 = vector.broadcast %4 : vector<16x1xf32> to vector<16x32xf32>
    %13 = arith.subf %0, %12 : vector<16x32xf32>
    %cst_4 = arith.constant 9.99999996E-13 : f32
    %14 = vector.broadcast %cst_4 : f32 to vector<16x1xf32>
    %15 = arith.addf %11, %14 : vector<16x1xf32>
    %16 = math.rsqrt %15 : vector<16x1xf32>
    %17 = vector.broadcast %16 : vector<16x1xf32> to vector<16x32xf32>
    %18 = arith.mulf %13, %17 : vector<16x32xf32>
    %c0_5 = arith.constant 0 : index
    %c0_6 = arith.constant 0 : index
    %19 = vector.load %arg2[%c0_5, %c0_6] : memref<1x32xf32, #tpu.memory_space<vmem>>, vector<1x32xf32>
    %20 = vector.broadcast %19 : vector<1x32xf32> to vector<16x32xf32>
    %21 = arith.mulf %18, %20 : vector<16x32xf32>
    %c0_7 = arith.constant 0 : index
    %c0_8 = arith.constant 0 : index
    %22 = vector.load %arg3[%c0_7, %c0_8] : memref<1x32xf32, #tpu.memory_space<vmem>>, vector<1x32xf32>
    %23 = vector.broadcast %22 : vector<1x32xf32> to vector<16x32xf32>
    %24 = arith.addf %21, %23 : vector<16x32xf32>
    %c0_9 = arith.constant 0 : index
    %c0_10 = arith.constant 0 : index
    %25 = vector.load %arg4[%c0_9, %c0_10] : memref<16x32xf32, #tpu.memory_space<vmem>>, vector<16x32xf32>
    tpu.vector_store %arg4[%c0_9, %c0_10], %24 {strides = array<i32>} : memref<16x32xf32, #tpu.memory_space<vmem>>, vector<16x32xf32>,
    return
  }
  func.func @transform_0(%arg0: i32) -> (i32, i32) {
    %c0_i32 = arith.constant 0 : i32
    %c0_i32_0 = arith.constant 0 : i32
    return %arg0, %c0_i32 : i32, i32
  }
  func.func @transform_1(%arg0: i32) -> (i32, i32) {
    %c0_i32 = arith.constant 0 : i32
    %c0_i32_0 = arith.constant 0 : i32
    %c0_i32_1 = arith.constant 0 : i32
    return %c0_i32, %c0_i32_0 : i32, i32
  }
  func.func @transform_2(%arg0: i32) -> (i32, i32) {
    %c0_i32 = arith.constant 0 : i32
    %c0_i32_0 = arith.constant 0 : i32
    %c0_i32_1 = arith.constant 0 : i32
    return %c0_i32, %c0_i32_0 : i32, i32
  }
  func.func @transform_3(%arg0: i32) -> (i32, i32) {
    %c0_i32 = arith.constant 0 : i32
    %c0_i32_0 = arith.constant 0 : i32
    return %arg0, %c0_i32 : i32, i32
  }
}

</mosaic_0001>

<bundles_post_ra>
// kernel: tpu_custom_call.1
= control target key start
LH: loop header
LB: loop body
LE: loop exit
PB: predicated region body
PF: predicated region fallthrough
CT: control target
= control target key end

     0   :  { %8 = vsyncpa [#allocation3], 0  ;;  %s220_s0 = inlined_call_operand.hbm [shape: f32[16,32], index: 0, kind: input, shape index: {}]   ;;  %s221_s1 = inlined_call_operand.vmem [shape: f32[1,32], index: 1, kind: input, shape index: {}]   ;;  %s222_s2 = inlined_call_operand.vmem [shape: f32[1,32], index: 2, kind: input, shape index: {}]   ;;  %s223_s3 = inlined_call_operand.hbm [shape: f32[16,32], index: 3, kind: output, shape index: {}]  }
   0x1   :  { %9 = vsyncpa [#allocation4], 0  ;;  %s154_s12 = smov [#allocation2]   ;;  %s106_s16 = scalar_lea.hbm %s220_s0, 256 }
   0x2   :  { %s15_s13 = sshll.u32 %s154_s12, 4  ;;  %p107_p0 = scmp.ne.s32.totalorder %s220_s0, %s106_s16  ;;  %s16_s13 = int_to_ptr.vmem [resolvable:$true] %s15_s13 }
   0x3   :  { %p110_p1 = scmp.lt.u32.totalorder %s106_s16, %s220_s0 }
   0x5   :  { %p112_p2 = pnand %p110_p1, %p107_p0 }
   0x7   :  { %115 = shalt.err (!%p112_p2)
}
   0x8   :  { %s116_s21 = scalar_lea.vmem %s16_s13, 256  ;;  %p121_p4 = scmp.lt.s32.totalorder %s16_s13, %s16_s13 }
   0x9   :  { %p117_p3 = scmp.ne.s32.totalorder %s16_s13, %s116_s21  ;;  %p122_p5 = scmp.lt.s32.totalorder %s116_s21, %s116_s21 }
   0xb   :  { %p123_p6 = por %p122_p5, %p121_p4 }
   0xd   :  { %p124_p7 = pnand %p123_p6, %p117_p3 }
   0xf   :  { %127 = shalt.err (!%p124_p7)
}
  0x10   :  { %s155_s22 = smov 128   ;;  %s156_s23 = smov 8  }
  0x11   :  { %21 = dma.hbm_to_vmem [thread:$0]  %s220_s0, 256, %s16_s13, [#allocation3], %s155_s22, %s155_s22, %s156_s23  }
  0x12   :  { %150 = dma.done.wait [#allocation3], 256  }
  0x13   :  { %151 = vsyncadd [#allocation3], 4294967040  ;;  %vm31_vm0 = vcmask 261120   ;;  %v29_v0 = vld [vmem:[#allocation2] sm:$0xff]  ;;  %v30_v1 = vld [vmem:[#allocation2 + $0x8] sm:$0xff]  ;;  %s157_s29 = smov [#allocation5]  }
  0x14   :  { %v32_v2 = vsel %vm31_vm0, %v29_v0, 0.0  ;;  %v35_v3 = vsel %vm31_vm0, %v30_v1, 0.0  ;;  %v96_v21 = vld [vmem:[%s221_s1] ss:$0 sm:$0xff]  ;;  %s84_s30 = sshll.u32 %s157_s29, 4  ;;  %s85_s30 = int_to_ptr.vmem [resolvable:$true] %s84_s30 }
  0x15   :  { %33 = vadd.xlane.f32.xlu0 %v32_v2  ;;  %v97_v23 = vld [vmem:[%s222_s2] ss:$0 sm:$0xff]  ;;  %s128_s4 = scalar_lea.vmem %s85_s30, 256  ;;  %p133_p9 = scmp.lt.s32.totalorder %s85_s30, %s85_s30 }
  0x16   :  { %p129_p8 = scmp.ne.s32.totalorder %s85_s30, %s128_s4  ;;  %p134_p10 = scmp.lt.s32.totalorder %s128_s4, %s128_s4 }
  0x18   :  { %p135_p11 = por %p134_p10, %p133_p9 }
  0x19   :  { %36 = vadd.xlane.f32.xlu0 %v35_v3 }
  0x1a   :  { %p136_p12 = pnand %p135_p11, %p129_p8 }
  0xa2   :  { %v34_v4 = vpop.xlane.xlu0 %33 }
  0xa3   :  { %v39_v5 = vmul.f32 0.03125, %v34_v4 }
  0xa5   :  { %v41_v6 = vsub.f32 %v29_v0, %v39_v5 }
  0xa6   :  { %v37_v7 = vpop.xlane.xlu0 %36 }
  0xa7   :  { %v40_v8 = vmul.f32 0.03125, %v37_v7  ;;  %v43_v9 = vmul.f32 %v41_v6, %v41_v6 }
  0xa9   :  { %v42_v10 = vsub.f32 %v30_v1, %v40_v8  ;;  %v45_v11 = vsel %vm31_vm0, %v43_v9, 0.0 }
  0xaa   :  { %46 = vadd.xlane.f32.xlu1 %v45_v11 }
  0xab   :  { %v44_v12 = vmul.f32 %v42_v10, %v42_v10 }
  0xad   :  { %v48_v13 = vsel %vm31_vm0, %v44_v12, 0.0 }
  0xae   :  { %49 = vadd.xlane.f32.xlu1 %v48_v13 }
 0x137   :  { %v47_v14 = vpop.xlane.xlu1 %46 }
 0x138   :  { %v51_v15 = vmul.f32 0.03125, %v47_v14 }
 0x13a   :  { %v53_v16 = vadd.f32 1e-12, %v51_v15 }
 0x13b   :  { %v50_v17 = vpop.xlane.xlu1 %49 }
 0x13c   :  { %102 = vrsqrt.f32 %v53_v16  ;;  %v52_v18 = vmul.f32 0.03125, %v50_v17 }
 0x13e   :  { %v54_v19 = vadd.f32 1e-12, %v52_v18 }
 0x140   :  { %104 = vrsqrt.f32 %v54_v19 }
 0x146   :  { %v103_v20 = vpop.eup %102 }
 0x147   :  { %v57_v22 = vmul.f32 %v103_v20, %v41_v6 }
 0x149   :  { %v66_v24 = vmul.f32 %v96_v21, %v57_v22 }
 0x14a   :  { %v105_v25 = vpop.eup %104 }
 0x14b   :  { %v58_v26 = vmul.f32 %v105_v25, %v42_v10  ;;  %v75_v27 = vadd.f32 %v97_v23, %v66_v24 }
 0x14d   :  { %v67_v28 = vmul.f32 %v96_v21, %v58_v26  ;;  %77 = vst.msk [vmem:[#allocation5] sm:$0xff] %vm31_vm0, %v75_v27 }
 0x14f   :  { %v76_v29 = vadd.f32 %v97_v23, %v67_v28 }
 0x151   :  { %78 = vst.msk [vmem:[#allocation5 + $0x8] sm:$0xff] %vm31_vm0, %v76_v29 }
 0x152   :  { %139 = shalt.err (!%p136_p12)
}
 0x153   :  { %s140_s5 = scalar_lea.hbm %s223_s3, 256 }
 0x154   :  { %p141_p13 = scmp.ne.s32.totalorder %s223_s3, %s140_s5  ;;  %p144_p0 = scmp.lt.u32.totalorder %s140_s5, %s223_s3 }
 0x156   :  { %p146_p1 = pnand %p144_p0, %p141_p13 }
 0x158   :  { %149 = shalt.err (!%p146_p1)
}
 0x159   :  { %90 = dma.vmem_to_hbm [thread:$0]  %s85_s30, 256, %s223_s3, [#allocation4], %s155_s22, %s155_s22, %s156_s23  }
 0x15a   :  { %152 = dma.done.wait [#allocation4], 256  }
 0x15b   :  { %153 = vsyncadd [#allocation4], 4294967040 }
 0x15c   :  { %94 = vsyncpa [#allocation3], 1 }
 0x15d   :  { %95 = vsyncpa [#allocation4], 1 }

</bundles_post_ra>
